<compile_context>
chip_gen: v7x
topology: tpu7x:2x2x1
jax: 0.10.0
libtpu: 0.0.40
codegen_flags: <defaults>
</compile_context>

<pallas_src>
import functools
import random

import numpy as np
import jax
import jax.numpy as jnp
from jax import lax
from jax.experimental import pallas as pl
from jax.experimental.pallas import tpu as pltpu


_LANE = 128
_MAX_PLANES_PER_STEP = 16


# ---------------------------------------------------------------------------
# Chip-aware VMEM budgets
# ---------------------------------------------------------------------------

@functools.lru_cache(maxsize=1)
def _vmem_capacity_bytes() -> int:
    try:
        info = pltpu.get_tpu_info()
        for attr in ("vmem_capacity_bytes", "vmem_bytes", "vmem_size_bytes"):
            v = getattr(info, attr, None)
            if v:
                return int(v)
    except Exception:
        pass
    return 64 * 1024 * 1024  # conservative default (v7x per-TC VMEM)


def _vmem_budgets():
    cap = _vmem_capacity_bytes()
    # Scoped limit with headroom: ~96-100 MiB on 128 MiB parts, ~48 MiB on v7x.
    limit = int(min(cap * 3 // 4, 100 * 1024 * 1024))
    work = limit * 6 // 10          # budget for the per-step working set
    return limit, work


def _pick_plane_block(n_planes: int, per_plane_bytes: int, fixed_bytes: int,
                      work_budget: int) -> int:
    """Largest divisor of n_planes whose full working set fits the budget."""
    cap = max(1, (work_budget - fixed_bytes) // max(per_plane_bytes, 1))
    cap = int(min(cap, _MAX_PLANES_PER_STEP, n_planes))
    if n_planes >= 2:
        cap = min(cap, n_planes // 2)   # >= 2 grid steps: both v7x TCs get work
    cap = max(1, cap)
    best = 1
    for b in range(cap, 0, -1):
        if n_planes % b == 0:
            best = b
            break
    for b in range(best, 0, -1):        # prefer an even number of grid steps
        if n_planes % b == 0 and (n_planes // b) % 2 == 0:
            return b
    return best


# ---------------------------------------------------------------------------
# Pallas kernel (factory: signature depends on which weight operands are needed)
# ---------------------------------------------------------------------------

def _make_resize_kernel(b_blk: int, do_y: bool, do_x: bool, y_first: bool,
                        out_dtype):
    """Kernel processing a block of `b_blk` (H_in, W_in) planes per grid step.

    wy_ref:  (H_out, H_in)   bf16
    wxt_ref: (W_in,  W_emit) bf16   (Wx pre-transposed [+ lane-padded] on host)
    t_ref:   bf16 VMEM scratch for the intermediate when both axes resize.
    """
    out_is_int = bool(jnp.issubdtype(out_dtype, jnp.integer))

    def _finalize(r):
        if out_is_int:
            info = jnp.iinfo(out_dtype)
            # TODO(synk): jnp.round is round-half-to-even; PyTorch uint8
            # interpolate rounds half away from zero (possible off-by-one on .5).
            r = jnp.clip(jnp.round(r), info.min, info.max)
        return r.astype(out_dtype)

    if do_y and do_x and y_first:
        def kernel(img_ref, wy_ref, wxt_ref, out_ref, t_ref):
            _, h_out, w_in = t_ref.shape
            w_emit = out_ref.shape[-1]
            wy = wy_ref[...]

            def body(b, carry):
                t_ref[b] = jnp.dot(
                    wy, img_ref[b].astype(jnp.bfloat16),
                    preferred_element_type=jnp.float32).astype(jnp.bfloat16)
                return carry
            lax.fori_loop(0, b_blk, body, 0, unroll=True)

            # Fold the W contraction across all planes: one matmul, M=b_blk*H_out.
            t2 = t_ref[...].reshape(b_blk * h_out, w_in)
            r = jnp.dot(t2, wxt_ref[...], preferred_element_type=jnp.float32)
            out_ref[...] = _finalize(r).reshape(b_blk, h_out, w_emit)

    elif do_y and do_x:  # x_first
        def kernel(img_ref, wy_ref, wxt_ref, out_ref, t_ref):
            _, h_in, w_in = img_ref.shape
            w_emit = out_ref.shape[-1]
            # Folded W contraction: one matmul, M = b_blk*H_in.
            x2 = img_ref[...].reshape(b_blk * h_in, w_in).astype(jnp.bfloat16)
            t = jnp.dot(x2, wxt_ref[...], preferred_element_type=jnp.float32)
            t_ref[...] = t.astype(jnp.bfloat16).reshape(b_blk, h_in, w_emit)
            wy = wy_ref[...]

            def body(b, carry):
                out_ref[b] = _finalize(
                    jnp.dot(wy, t_ref[b], preferred_element_type=jnp.float32))
                return carry
            lax.fori_loop(0, b_blk, body, 0, unroll=True)

    elif do_y:
        def kernel(img_ref, wy_ref, out_ref):
            wy = wy_ref[...]

            def body(b, carry):
                out_ref[b] = _finalize(
                    jnp.dot(wy, img_ref[b].astype(jnp.bfloat16),
                            preferred_element_type=jnp.float32))
                return carry
            lax.fori_loop(0, b_blk, body, 0, unroll=True)

    else:  # do_x only: fully folded, no per-plane loop at all
        def kernel(img_ref, wxt_ref, out_ref):
            _, h_in, w_in = img_ref.shape
            _, h_out, w_emit = out_ref.shape
            x2 = img_ref[...].reshape(b_blk * h_in, w_in).astype(jnp.bfloat16)
            r = jnp.dot(x2, wxt_ref[...], preferred_element_type=jnp.float32)
            out_ref[...] = _finalize(r).reshape(b_blk, h_out, w_emit)

    return kernel


# ---------------------------------------------------------------------------
# Interpolation weights (host-built, cached, uploaded once as bf16)
# ---------------------------------------------------------------------------

def _bilinear_weights_np(out_size: int, in_size: int) -> np.ndarray:
    """PyTorch F.interpolate(mode='bilinear', align_corners=False) weights."""
    if out_size == in_size:
        return np.eye(out_size, dtype=np.float32)
    scale = in_size / out_size
    oi = np.arange(out_size)
    src = (oi + 0.5) * scale - 0.5
    src = np.maximum(src, 0.0)
    i0 = np.minimum(np.floor(src).astype(np.int64), in_size - 1)
    i1 = np.minimum(i0 + 1, in_size - 1)
    lam = (src - i0).astype(np.float32)
    w = np.zeros((out_size, in_size), dtype=np.float32)
    np.add.at(w, (oi, i0), 1.0 - lam)
    np.add.at(w, (oi, i1), lam)
    return w


@functools.lru_cache(maxsize=64)
def _wy_cached(h_out: int, h_in: int):
    return jnp.asarray(_bilinear_weights_np(h_out, h_in), dtype=jnp.bfloat16)


@functools.lru_cache(maxsize=64)
def _wxt_cached(w_out: int, w_in: int, w_emit: int):
    wxt = _bilinear_weights_np(w_out, w_in).T             # (W_in, W_out), pre-T
    if w_emit != w_out:
        wxt = np.pad(wxt, ((0, 0), (0, w_emit - w_out)))  # zero lane padding
    return jnp.asarray(wxt, dtype=jnp.bfloat16)


# ---------------------------------------------------------------------------
# Wrapper
# ---------------------------------------------------------------------------

def bilinear_resize_nchw(inputs: jnp.ndarray, size) -> jnp.ndarray:
    """Resize NCHW tensor to size=(H_out, W_out) with PyTorch bilinear semantics."""
    n, c, h_in, w_in = inputs.shape
    h_out, w_out = int(size[0]), int(size[1])
    if (h_out, w_out) == (h_in, w_in):
        return inputs

    do_y = h_out != h_in
    do_x = w_out != w_in

    # Emit W_out directly when it is lane-sized or larger (one masked tail store
    # beats re-copying the whole output with a post-kernel slice).  Only small
    # widths are padded to a single lane tile and sliced afterwards.
    w_emit = _LANE if (do_x and w_out < _LANE) else w_out

    # Static matmul-order choice (minimize MXU MACs).  The W contraction is
    # folded across planes in either order, so FLOPs are the differentiator.
    y_first = True
    if do_y and do_x:
        flops_y_first = h_out * h_in * w_in + h_out * w_in * w_emit
        flops_x_first = h_in * w_in * w_emit + h_out * h_in * w_emit
        y_first = flops_y_first <= flops_x_first

    n_planes = n * c
    itemsize = inputs.dtype.itemsize

    # Per-step VMEM footprint: double-buffered img/out blocks + bf16 input copy +
    # f32 matmul results + bf16 intermediate scratch.  Weights are a fixed cost
    # (counted twice in case single-buffer pipeline_mode falls back).
    t_elems = 0
    if do_y and do_x:
        t_elems = h_out * w_in if y_first else h_in * w_emit
    per_plane = (2 * h_in * w_in * itemsize
                 + 2 * h_out * w_emit * itemsize
                 + h_in * w_in * 2
                 + t_elems * (2 + 4)
                 + h_out * w_emit * 4)
    fixed = 0
    if do_y:
        fixed += 2 * h_out * h_in * 2
    if do_x:
        fixed += 2 * w_in * w_emit * 2

    vmem_limit, work_budget = _vmem_budgets()
    b_blk = _pick_plane_block(n_planes, per_plane, fixed, work_budget)

    flat = inputs.reshape(n_planes, h_in, w_in)
    kernel = _make_resize_kernel(b_blk, do_y, do_x, y_first, inputs.dtype)

    def _run(weight_pipeline_mode):
        def _wspec(shape):
            if weight_pipeline_mode is None:
                return pl.BlockSpec(shape, lambda i: (0, 0))
            return pl.BlockSpec(shape, lambda i: (0, 0),
                                pipeline_mode=weight_pipeline_mode)

        in_specs = [pl.BlockSpec((b_blk, h_in, w_in), lambda i: (i, 0, 0))]
        operands = [flat]
        if do_y:
            in_specs.append(_wspec((h_out, h_in)))
            operands.append(_wy_cached(h_out, h_in))
        if do_x:
            in_specs.append(_wspec((w_in, w_emit)))
            operands.append(_wxt_cached(w_out, w_in, w_emit))

        scratch = []
        if do_y and do_x:
            t_shape = (b_blk, h_out, w_in) if y_first else (b_blk, h_in, w_emit)
            scratch = [pltpu.VMEM(t_shape, jnp.bfloat16)]

        return pl.pallas_call(
            kernel,
            out_shape=jax.ShapeDtypeStruct((n_planes, h_out, w_emit), inputs.dtype),
            grid_spec=pltpu.PrefetchScalarGridSpec(
                num_scalar_prefetch=0,
                grid=(n_planes // b_blk,),
                in_specs=in_specs,
                out_specs=pl.BlockSpec((b_blk, h_out, w_emit),
                                       lambda i: (i, 0, 0)),
                scratch_shapes=scratch),
            compiler_params=pltpu.CompilerParams(
                dimension_semantics=("parallel",),
                vmem_limit_bytes=int(vmem_limit)),
        )(*operands)

    try:
        # Weights have a constant index_map -> single-buffer them (halves their VMEM).
        out = _run(pl.Buffered(1))
    except Exception:
        out = _run(None)  # fallback: default double buffering

    if w_emit != w_out:
        out = out[:, :, :w_out]       # only taken for w_out < 128 (cheap slice)
    return out.reshape(n, c, h_out, w_out)


def scale_bboxes(bboxes: jnp.ndarray, scale_x: float, scale_y: float) -> jnp.ndarray:
    """(K, 4) [x1, y1, x2, y2] boxes; x-coords *= sx, y-coords *= sy.

    Plain jnp: a Pallas launch per (K,4) tile is pure dispatch overhead.
    """
    scale = jnp.asarray([scale_x, scale_y, scale_x, scale_y], dtype=bboxes.dtype)
    return bboxes * scale


# ---------------------------------------------------------------------------
# Module port
# ---------------------------------------------------------------------------

class BatchSyncRandomResize:
    """JAX/Pallas port of BatchSyncRandomResize (single-rank)."""

    def __init__(self, random_size_range, interval=10, size_divisor=32):
        self.rank, self.world_size = 0, 1
        self._input_size = None
        self._random_size_range = (
            round(random_size_range[0] / size_divisor),
            round(random_size_range[1] / size_divisor),
        )
        self._interval = interval
        self._size_divisor = size_divisor
        self._rng = random.Random(0)  # deterministic in-script "rank 0" RNG

    def forward(self, inputs, data_samples, iter_idx):
        h, w = inputs.shape[-2:]
        if self._input_size is None:
            self._input_size = (h, w)
        scale_y = self._input_size[0] / h
        scale_x = self._input_size[1] / w

        if scale_x != 1 or scale_y != 1:
            inputs = bilinear_resize_nchw(inputs, self._input_size)
            for ds in data_samples:
                ds["img_shape"] = (int(ds["img_shape"][0] * scale_y),
                                   int(ds["img_shape"][1] * scale_x))
                ds["pad_shape"] = (int(ds["pad_shape"][0] * scale_y),
                                   int(ds["pad_shape"][1] * scale_x))
                ds["batch_input_shape"] = self._input_size
                ds["bboxes"] = scale_bboxes(ds["bboxes"], scale_x, scale_y)
                if "ignored_bboxes" in ds:
                    ds["ignored_bboxes"] = scale_bboxes(
                        ds["ignored_bboxes"], scale_x, scale_y)

        if (iter_idx + 1) % self._interval == 0:
            # TODO(synk): distributed barrier/broadcast replaced by rank-0 RNG.
            self._input_size = self._get_random_size(aspect_ratio=float(w / h))
        return inputs, data_samples

    def _get_random_size(self, aspect_ratio: float):
        size = self._rng.randint(*self._random_size_range)
        return (self._size_divisor * size,
                self._size_divisor * int(aspect_ratio * size))


# ---------------------------------------------------------------------------
# Demo / smoke test
# ---------------------------------------------------------------------------

if __name__ == "__main__":
    key = jax.random.PRNGKey(0)
    k1, k2, k3 = jax.random.split(key, 3)

    N, C, H, W = 2, 4, 16, 16
    inputs = jax.random.normal(k1, (N, C, H, W), dtype=jnp.float32)

    data_samples = []
    for kk in (k2, k3):
        bboxes = jax.random.uniform(kk, (8, 4), dtype=jnp.float32) * H
        data_samples.append({"img_shape": (H, W), "pad_shape": (H, W),
                             "bboxes": bboxes})

    # size_divisor=8, range (24, 32) -> candidate sizes {24, 32}: always != 16,
    # so iteration 1 is guaranteed to exercise the resize kernel.
    module = BatchSyncRandomResize(
        random_size_range=(24, 32), interval=1, size_divisor=8)

    # Iter 0: _input_size is None -> no resize; draws the next random size.
    out0, data_samples = module.forward(inputs, data_samples, iter_idx=0)
    target = module._input_size          # size used for iteration 1

    # Iter 1: resize batch (and bboxes) to `target`.
    out1, data_samples = module.forward(inputs, data_samples, iter_idx=1)
    out1 = jax.block_until_ready(out1)
    for ds in data_samples:
        jax.block_until_ready(ds["bboxes"])

    # Reference (f32, plain JAX). Kernel uses bf16 operands with f32 accumulation,
    # so tolerances are relaxed accordingly.
    h_out, w_out = target
    wy = _bilinear_weights_np(h_out, H)
    wx = _bilinear_weights_np(w_out, W)
    ref = jnp.einsum("oh,nchw,pw->ncop", wy, inputs, wx)
    assert out1.shape == (N, C, h_out, w_out), out1.shape
    assert jnp.allclose(out1, ref, atol=5e-2, rtol=5e-2), "resize mismatch"

    # Extra path coverage: X-only resize (folded single matmul, padded 96 -> 128).
    out_x = jax.block_until_ready(bilinear_resize_nchw(inputs, (H, 96)))
    ref_x = jnp.einsum("nchw,pw->nchp", inputs, _bilinear_weights_np(96, W))
    assert out_x.shape == (N, C, H, 96)
    assert jnp.allclose(out_x, ref_x, atol=5e-2, rtol=5e-2), "x-only mismatch"

    # Extra path coverage: Y-only resize (fori_loop per-plane, no W matmul).
    out_y = jax.block_until_ready(bilinear_resize_nchw(inputs, (40, W)))
    ref_y = jnp.einsum("oh,nchw->ncow", _bilinear_weights_np(40, H), inputs)
    assert out_y.shape == (N, C, 40, W)
    assert jnp.allclose(out_y, ref_y, atol=5e-2, rtol=5e-2), "y-only mismatch"

    print("KERNEL_OK")
</pallas_src>

<mosaic_0001>
module attributes {stable_mosaic.version = 11 : i64} {
  func.func @kernel(%arg0: i32, %arg1: memref<4x16x16xf32, #tpu.memory_space<vmem>>, %arg2: memref<32x16xbf16, #tpu.memory_space<vmem>>, %arg3: memref<16x128xbf16, #tpu.memory_space<vmem>>, %arg4: memref<4x32x128xf32, #tpu.memory_space<vmem>>, %arg5: memref<4x32x16xbf16, #tpu.memory_space<vmem>>) attributes {dimension_semantics = [#tpu.dimension_semantics<parallel>], iteration_bounds = array<i64: 2>, scalar_prefetch = 0 : i64, scratch_operands = 1 : i64, tpu.core_type = #tpu.core_type<tc>, window_params = [{transform_indices = @transform_0, window_bounds = array<i64: 4, 16, 16>}, {pipeline_mode = #tpu.pipeline_mode<synchronous>, transform_indices = @transform_1, window_bounds = array<i64: 32, 16>}, {pipeline_mode = #tpu.pipeline_mode<synchronous>, transform_indices = @transform_2, window_bounds = array<i64: 16, 128>}, {transform_indices = @transform_3, window_bounds = array<i64: 4, 32, 128>}]} {
    %c0 = arith.constant 0 : index
    %c0_0 = arith.constant 0 : index
    %0 = vector.load %arg2[%c0, %c0_0] : memref<32x16xbf16, #tpu.memory_space<vmem>>, vector<32x16xbf16>
    %c0_i32 = arith.constant 0 : i32
    %1 = arith.index_cast %c0_i32 : i32 to index
    %c0_1 = arith.constant 0 : index
    %c0_2 = arith.constant 0 : index
    %2 = vector.load %arg1[%1, %c0_1, %c0_2] : memref<4x16x16xf32, #tpu.memory_space<vmem>>, vector<1x16x16xf32>
    %3 = vector.shape_cast %2 : vector<1x16x16xf32> to vector<16x16xf32>
    %4 = arith.truncf %3 : vector<16x16xf32> to vector<16x16xbf16>
    %cst = arith.constant dense<0.000000e+00> : vector<32x16xf32>
    %5 = tpu.matmul %0, %4, %cst {dimension_numbers = #tpu.dot_dimension_numbers<[1], [0], [0], [1], [0, 0, 1, 1], [], []>} : vector<32x16xbf16>, vector<16x16xbf16>, vector<32x16xf32> -> vector<32x16xf32>
    %6 = arith.truncf %5 : vector<32x16xf32> to vector<32x16xbf16>
    %7 = arith.index_cast %c0_i32 : i32 to index
    %c0_3 = arith.constant 0 : index
    %c0_4 = arith.constant 0 : index
    %8 = vector.load %arg5[%7, %c0_3, %c0_4] : memref<4x32x16xbf16, #tpu.memory_space<vmem>>, vector<1x32x16xbf16>
    %9 = vector.shape_cast %8 : vector<1x32x16xbf16> to vector<32x16xbf16>
    %10 = vector.shape_cast %6 : vector<32x16xbf16> to vector<1x32x16xbf16>
    tpu.vector_store %arg5[%7, %c0_3, %c0_4], %10 {strides = array<i32>} : memref<4x32x16xbf16, #tpu.memory_space<vmem>>, vector<1x32x16xbf16>,
    %c1_i32 = arith.constant 1 : i32
    %11 = arith.index_cast %c1_i32 : i32 to index
    %c0_5 = arith.constant 0 : index
    %c0_6 = arith.constant 0 : index
    %12 = vector.load %arg1[%11, %c0_5, %c0_6] : memref<4x16x16xf32, #tpu.memory_space<vmem>>, vector<1x16x16xf32>
    %13 = vector.shape_cast %12 : vector<1x16x16xf32> to vector<16x16xf32>
    %14 = arith.truncf %13 : vector<16x16xf32> to vector<16x16xbf16>
    %cst_7 = arith.constant dense<0.000000e+00> : vector<32x16xf32>
    %15 = tpu.matmul %0, %14, %cst_7 {dimension_numbers = #tpu.dot_dimension_numbers<[1], [0], [0], [1], [0, 0, 1, 1], [], []>} : vector<32x16xbf16>, vector<16x16xbf16>, vector<32x16xf32> -> vector<32x16xf32>
    %16 = arith.truncf %15 : vector<32x16xf32> to vector<32x16xbf16>
    %17 = arith.index_cast %c1_i32 : i32 to index
    %c0_8 = arith.constant 0 : index
    %c0_9 = arith.constant 0 : index
    %18 = vector.load %arg5[%17, %c0_8, %c0_9] : memref<4x32x16xbf16, #tpu.memory_space<vmem>>, vector<1x32x16xbf16>
    %19 = vector.shape_cast %18 : vector<1x32x16xbf16> to vector<32x16xbf16>
    %20 = vector.shape_cast %16 : vector<32x16xbf16> to vector<1x32x16xbf16>
    tpu.vector_store %arg5[%17, %c0_8, %c0_9], %20 {strides = array<i32>} : memref<4x32x16xbf16, #tpu.memory_space<vmem>>, vector<1x32x16xbf16>,
    %c2_i32 = arith.constant 2 : i32
    %21 = arith.index_cast %c2_i32 : i32 to index
    %c0_10 = arith.constant 0 : index
    %c0_11 = arith.constant 0 : index
    %22 = vector.load %arg1[%21, %c0_10, %c0_11] : memref<4x16x16xf32, #tpu.memory_space<vmem>>, vector<1x16x16xf32>
    %23 = vector.shape_cast %22 : vector<1x16x16xf32> to vector<16x16xf32>
    %24 = arith.truncf %23 : vector<16x16xf32> to vector<16x16xbf16>
    %cst_12 = arith.constant dense<0.000000e+00> : vector<32x16xf32>
    %25 = tpu.matmul %0, %24, %cst_12 {dimension_numbers = #tpu.dot_dimension_numbers<[1], [0], [0], [1], [0, 0, 1, 1], [], []>} : vector<32x16xbf16>, vector<16x16xbf16>, vector<32x16xf32> -> vector<32x16xf32>
    %26 = arith.truncf %25 : vector<32x16xf32> to vector<32x16xbf16>
    %27 = arith.index_cast %c2_i32 : i32 to index
    %c0_13 = arith.constant 0 : index
    %c0_14 = arith.constant 0 : index
    %28 = vector.load %arg5[%27, %c0_13, %c0_14] : memref<4x32x16xbf16, #tpu.memory_space<vmem>>, vector<1x32x16xbf16>
    %29 = vector.shape_cast %28 : vector<1x32x16xbf16> to vector<32x16xbf16>
    %30 = vector.shape_cast %26 : vector<32x16xbf16> to vector<1x32x16xbf16>
    tpu.vector_store %arg5[%27, %c0_13, %c0_14], %30 {strides = array<i32>} : memref<4x32x16xbf16, #tpu.memory_space<vmem>>, vector<1x32x16xbf16>,
    %c3_i32 = arith.constant 3 : i32
    %31 = arith.index_cast %c3_i32 : i32 to index
    %c0_15 = arith.constant 0 : index
    %c0_16 = arith.constant 0 : index
    %32 = vector.load %arg1[%31, %c0_15, %c0_16] : memref<4x16x16xf32, #tpu.memory_space<vmem>>, vector<1x16x16xf32>
    %33 = vector.shape_cast %32 : vector<1x16x16xf32> to vector<16x16xf32>
    %34 = arith.truncf %33 : vector<16x16xf32> to vector<16x16xbf16>
    %cst_17 = arith.constant dense<0.000000e+00> : vector<32x16xf32>
    %35 = tpu.matmul %0, %34, %cst_17 {dimension_numbers = #tpu.dot_dimension_numbers<[1], [0], [0], [1], [0, 0, 1, 1], [], []>} : vector<32x16xbf16>, vector<16x16xbf16>, vector<32x16xf32> -> vector<32x16xf32>
    %36 = arith.truncf %35 : vector<32x16xf32> to vector<32x16xbf16>
    %37 = arith.index_cast %c3_i32 : i32 to index
    %c0_18 = arith.constant 0 : index
    %c0_19 = arith.constant 0 : index
    %38 = vector.load %arg5[%37, %c0_18, %c0_19] : memref<4x32x16xbf16, #tpu.memory_space<vmem>>, vector<1x32x16xbf16>
    %39 = vector.shape_cast %38 : vector<1x32x16xbf16> to vector<32x16xbf16>
    %40 = vector.shape_cast %36 : vector<32x16xbf16> to vector<1x32x16xbf16>
    tpu.vector_store %arg5[%37, %c0_18, %c0_19], %40 {strides = array<i32>} : memref<4x32x16xbf16, #tpu.memory_space<vmem>>, vector<1x32x16xbf16>,
    %c4_i32 = arith.constant 4 : i32
    %c0_20 = arith.constant 0 : index
    %c0_21 = arith.constant 0 : index
    %c0_22 = arith.constant 0 : index
    %41 = vector.load %arg5[%c0_20, %c0_21, %c0_22] : memref<4x32x16xbf16, #tpu.memory_space<vmem>>, vector<4x32x16xbf16>
    %42 = vector.shape_cast %41 : vector<4x32x16xbf16> to vector<128x16xbf16>
    %c0_23 = arith.constant 0 : index
    %c0_24 = arith.constant 0 : index
    %43 = vector.load %arg3[%c0_23, %c0_24] : memref<16x128xbf16, #tpu.memory_space<vmem>>, vector<16x128xbf16>
    %cst_25 = arith.constant dense<0.000000e+00> : vector<128x128xf32>
    %44 = tpu.matmul %42, %43, %cst_25 {dimension_numbers = #tpu.dot_dimension_numbers<[1], [0], [0], [1], [0, 0, 1, 1], [], []>} : vector<128x16xbf16>, vector<16x128xbf16>, vector<128x128xf32> -> vector<128x128xf32>
    %45 = vector.shape_cast %44 : vector<128x128xf32> to vector<4x32x128xf32>
    %c0_26 = arith.constant 0 : index
    %c0_27 = arith.constant 0 : index
    %c0_28 = arith.constant 0 : index
    %46 = vector.load %arg4[%c0_26, %c0_27, %c0_28] : memref<4x32x128xf32, #tpu.memory_space<vmem>>, vector<4x32x128xf32>
    tpu.vector_store %arg4[%c0_26, %c0_27, %c0_28], %45 {strides = array<i32>} : memref<4x32x128xf32, #tpu.memory_space<vmem>>, vector<4x32x128xf32>,
    return
  }
  func.func @transform_0(%arg0: i32) -> (i32, i32, i32) {
    %c0_i32 = arith.constant 0 : i32
    %c0_i32_0 = arith.constant 0 : i32
    %c0_i32_1 = arith.constant 0 : i32
    return %arg0, %c0_i32, %c0_i32_0 : i32, i32, i32
  }
  func.func @transform_1(%arg0: i32) -> (i32, i32) {
    %c0_i32 = arith.constant 0 : i32
    %c0_i32_0 = arith.constant 0 : i32
    %c0_i32_1 = arith.constant 0 : i32
    return %c0_i32, %c0_i32_0 : i32, i32
  }
  func.func @transform_2(%arg0: i32) -> (i32, i32) {
    %c0_i32 = arith.constant 0 : i32
    %c0_i32_0 = arith.constant 0 : i32
    %c0_i32_1 = arith.constant 0 : i32
    return %c0_i32, %c0_i32_0 : i32, i32
  }
  func.func @transform_3(%arg0: i32) -> (i32, i32, i32) {
    %c0_i32 = arith.constant 0 : i32
    %c0_i32_0 = arith.constant 0 : i32
    %c0_i32_1 = arith.constant 0 : i32
    return %arg0, %c0_i32, %c0_i32_0 : i32, i32, i32
  }
}

module attributes {stable_mosaic.version = 11 : i64} {
  func.func @kernel(%arg0: i32, %arg1: memref<4x16x16xf32, #tpu.memory_space<vmem>>, %arg2: memref<32x16xbf16, #tpu.memory_space<vmem>>, %arg3: memref<16x128xbf16, #tpu.memory_space<vmem>>, %arg4: memref<4x32x128xf32, #tpu.memory_space<vmem>>, %arg5: memref<4x32x16xbf16, #tpu.memory_space<vmem>>) attributes {dimension_semantics = [#tpu.dimension_semantics<parallel>], iteration_bounds = array<i64: 2>, scalar_prefetch = 0 : i64, scratch_operands = 1 : i64, tpu.core_type = #tpu.core_type<tc>, window_params = [{transform_indices = @transform_0, window_bounds = array<i64: 4, 16, 16>}, {pipeline_mode = #tpu.pipeline_mode<synchronous>, transform_indices = @transform_1, window_bounds = array<i64: 32, 16>}, {pipeline_mode = #tpu.pipeline_mode<synchronous>, transform_indices = @transform_2, window_bounds = array<i64: 16, 128>}, {transform_indices = @transform_3, window_bounds = array<i64: 4, 32, 128>}]} {
    %c0 = arith.constant 0 : index
    %c0_0 = arith.constant 0 : index
    %0 = vector.load %arg2[%c0, %c0_0] : memref<32x16xbf16, #tpu.memory_space<vmem>>, vector<32x16xbf16>
    %c0_i32 = arith.constant 0 : i32
    %1 = arith.index_cast %c0_i32 : i32 to index
    %c0_1 = arith.constant 0 : index
    %c0_2 = arith.constant 0 : index
    %2 = vector.load %arg1[%1, %c0_1, %c0_2] : memref<4x16x16xf32, #tpu.memory_space<vmem>>, vector<1x16x16xf32>
    %3 = vector.shape_cast %2 : vector<1x16x16xf32> to vector<16x16xf32>
    %4 = arith.truncf %3 : vector<16x16xf32> to vector<16x16xbf16>
    %cst = arith.constant dense<0.000000e+00> : vector<32x16xf32>
    %5 = tpu.matmul %0, %4, %cst {dimension_numbers = #tpu.dot_dimension_numbers<[1], [0], [0], [1], [0, 0, 1, 1], [], []>} : vector<32x16xbf16>, vector<16x16xbf16>, vector<32x16xf32> -> vector<32x16xf32>
    %6 = arith.truncf %5 : vector<32x16xf32> to vector<32x16xbf16>
    %7 = arith.index_cast %c0_i32 : i32 to index
    %c0_3 = arith.constant 0 : index
    %c0_4 = arith.constant 0 : index
    %8 = vector.load %arg5[%7, %c0_3, %c0_4] : memref<4x32x16xbf16, #tpu.memory_space<vmem>>, vector<1x32x16xbf16>
    %9 = vector.shape_cast %8 : vector<1x32x16xbf16> to vector<32x16xbf16>
    %10 = vector.shape_cast %6 : vector<32x16xbf16> to vector<1x32x16xbf16>
    tpu.vector_store %arg5[%7, %c0_3, %c0_4], %10 {strides = array<i32>} : memref<4x32x16xbf16, #tpu.memory_space<vmem>>, vector<1x32x16xbf16>,
    %c1_i32 = arith.constant 1 : i32
    %11 = arith.index_cast %c1_i32 : i32 to index
    %c0_5 = arith.constant 0 : index
    %c0_6 = arith.constant 0 : index
    %12 = vector.load %arg1[%11, %c0_5, %c0_6] : memref<4x16x16xf32, #tpu.memory_space<vmem>>, vector<1x16x16xf32>
    %13 = vector.shape_cast %12 : vector<1x16x16xf32> to vector<16x16xf32>
    %14 = arith.truncf %13 : vector<16x16xf32> to vector<16x16xbf16>
    %cst_7 = arith.constant dense<0.000000e+00> : vector<32x16xf32>
    %15 = tpu.matmul %0, %14, %cst_7 {dimension_numbers = #tpu.dot_dimension_numbers<[1], [0], [0], [1], [0, 0, 1, 1], [], []>} : vector<32x16xbf16>, vector<16x16xbf16>, vector<32x16xf32> -> vector<32x16xf32>
    %16 = arith.truncf %15 : vector<32x16xf32> to vector<32x16xbf16>
    %17 = arith.index_cast %c1_i32 : i32 to index
    %c0_8 = arith.constant 0 : index
    %c0_9 = arith.constant 0 : index
    %18 = vector.load %arg5[%17, %c0_8, %c0_9] : memref<4x32x16xbf16, #tpu.memory_space<vmem>>, vector<1x32x16xbf16>
    %19 = vector.shape_cast %18 : vector<1x32x16xbf16> to vector<32x16xbf16>
    %20 = vector.shape_cast %16 : vector<32x16xbf16> to vector<1x32x16xbf16>
    tpu.vector_store %arg5[%17, %c0_8, %c0_9], %20 {strides = array<i32>} : memref<4x32x16xbf16, #tpu.memory_space<vmem>>, vector<1x32x16xbf16>,
    %c2_i32 = arith.constant 2 : i32
    %21 = arith.index_cast %c2_i32 : i32 to index
    %c0_10 = arith.constant 0 : index
    %c0_11 = arith.constant 0 : index
    %22 = vector.load %arg1[%21, %c0_10, %c0_11] : memref<4x16x16xf32, #tpu.memory_space<vmem>>, vector<1x16x16xf32>
    %23 = vector.shape_cast %22 : vector<1x16x16xf32> to vector<16x16xf32>
    %24 = arith.truncf %23 : vector<16x16xf32> to vector<16x16xbf16>
    %cst_12 = arith.constant dense<0.000000e+00> : vector<32x16xf32>
    %25 = tpu.matmul %0, %24, %cst_12 {dimension_numbers = #tpu.dot_dimension_numbers<[1], [0], [0], [1], [0, 0, 1, 1], [], []>} : vector<32x16xbf16>, vector<16x16xbf16>, vector<32x16xf32> -> vector<32x16xf32>
    %26 = arith.truncf %25 : vector<32x16xf32> to vector<32x16xbf16>
    %27 = arith.index_cast %c2_i32 : i32 to index
    %c0_13 = arith.constant 0 : index
    %c0_14 = arith.constant 0 : index
    %28 = vector.load %arg5[%27, %c0_13, %c0_14] : memref<4x32x16xbf16, #tpu.memory_space<vmem>>, vector<1x32x16xbf16>
    %29 = vector.shape_cast %28 : vector<1x32x16xbf16> to vector<32x16xbf16>
    %30 = vector.shape_cast %26 : vector<32x16xbf16> to vector<1x32x16xbf16>
    tpu.vector_store %arg5[%27, %c0_13, %c0_14], %30 {strides = array<i32>} : memref<4x32x16xbf16, #tpu.memory_space<vmem>>, vector<1x32x16xbf16>,
    %c3_i32 = arith.constant 3 : i32
    %31 = arith.index_cast %c3_i32 : i32 to index
    %c0_15 = arith.constant 0 : index
    %c0_16 = arith.constant 0 : index
    %32 = vector.load %arg1[%31, %c0_15, %c0_16] : memref<4x16x16xf32, #tpu.memory_space<vmem>>, vector<1x16x16xf32>
    %33 = vector.shape_cast %32 : vector<1x16x16xf32> to vector<16x16xf32>
    %34 = arith.truncf %33 : vector<16x16xf32> to vector<16x16xbf16>
    %cst_17 = arith.constant dense<0.000000e+00> : vector<32x16xf32>
    %35 = tpu.matmul %0, %34, %cst_17 {dimension_numbers = #tpu.dot_dimension_numbers<[1], [0], [0], [1], [0, 0, 1, 1], [], []>} : vector<32x16xbf16>, vector<16x16xbf16>, vector<32x16xf32> -> vector<32x16xf32>
    %36 = arith.truncf %35 : vector<32x16xf32> to vector<32x16xbf16>
    %37 = arith.index_cast %c3_i32 : i32 to index
    %c0_18 = arith.constant 0 : index
    %c0_19 = arith.constant 0 : index
    %38 = vector.load %arg5[%37, %c0_18, %c0_19] : memref<4x32x16xbf16, #tpu.memory_space<vmem>>, vector<1x32x16xbf16>
    %39 = vector.shape_cast %38 : vector<1x32x16xbf16> to vector<32x16xbf16>
    %40 = vector.shape_cast %36 : vector<32x16xbf16> to vector<1x32x16xbf16>
    tpu.vector_store %arg5[%37, %c0_18, %c0_19], %40 {strides = array<i32>} : memref<4x32x16xbf16, #tpu.memory_space<vmem>>, vector<1x32x16xbf16>,
    %c4_i32 = arith.constant 4 : i32
    %c0_20 = arith.constant 0 : index
    %c0_21 = arith.constant 0 : index
    %c0_22 = arith.constant 0 : index
    %41 = vector.load %arg5[%c0_20, %c0_21, %c0_22] : memref<4x32x16xbf16, #tpu.memory_space<vmem>>, vector<4x32x16xbf16>
    %42 = vector.shape_cast %41 : vector<4x32x16xbf16> to vector<128x16xbf16>
    %c0_23 = arith.constant 0 : index
    %c0_24 = arith.constant 0 : index
    %43 = vector.load %arg3[%c0_23, %c0_24] : memref<16x128xbf16, #tpu.memory_space<vmem>>, vector<16x128xbf16>
    %cst_25 = arith.constant dense<0.000000e+00> : vector<128x128xf32>
    %44 = tpu.matmul %42, %43, %cst_25 {dimension_numbers = #tpu.dot_dimension_numbers<[1], [0], [0], [1], [0, 0, 1, 1], [], []>} : vector<128x16xbf16>, vector<16x128xbf16>, vector<128x128xf32> -> vector<128x128xf32>
    %45 = vector.shape_cast %44 : vector<128x128xf32> to vector<4x32x128xf32>
    %c0_26 = arith.constant 0 : index
    %c0_27 = arith.constant 0 : index
    %c0_28 = arith.constant 0 : index
    %46 = vector.load %arg4[%c0_26, %c0_27, %c0_28] : memref<4x32x128xf32, #tpu.memory_space<vmem>>, vector<4x32x128xf32>
    tpu.vector_store %arg4[%c0_26, %c0_27, %c0_28], %45 {strides = array<i32>} : memref<4x32x128xf32, #tpu.memory_space<vmem>>, vector<4x32x128xf32>,
    return
  }
  func.func @transform_0(%arg0: i32) -> (i32, i32, i32) {
    %c0_i32 = arith.constant 0 : i32
    %c0_i32_0 = arith.constant 0 : i32
    %c0_i32_1 = arith.constant 0 : i32
    return %arg0, %c0_i32, %c0_i32_0 : i32, i32, i32
  }
  func.func @transform_1(%arg0: i32) -> (i32, i32) {
    %c0_i32 = arith.constant 0 : i32
    %c0_i32_0 = arith.constant 0 : i32
    %c0_i32_1 = arith.constant 0 : i32
    return %c0_i32, %c0_i32_0 : i32, i32
  }
  func.func @transform_2(%arg0: i32) -> (i32, i32) {
    %c0_i32 = arith.constant 0 : i32
    %c0_i32_0 = arith.constant 0 : i32
    %c0_i32_1 = arith.constant 0 : i32
    return %c0_i32, %c0_i32_0 : i32, i32
  }
  func.func @transform_3(%arg0: i32) -> (i32, i32, i32) {
    %c0_i32 = arith.constant 0 : i32
    %c0_i32_0 = arith.constant 0 : i32
    %c0_i32_1 = arith.constant 0 : i32
    return %arg0, %c0_i32, %c0_i32_0 : i32, i32, i32
  }
}

</mosaic_0001>

<bundles_post_ra>
// kernel: tpu_custom_call.1
= control target key start
LH: loop header
LB: loop body
LE: loop exit
PB: predicated region body
PF: predicated region fallthrough
CT: control target
= control target key end

     0   :  { %8 = vsyncpa [#allocation4], 0  ;;  %s1187_s0 = inlined_call_operand.hbm [shape: f32[8,16,16], index: 0, kind: input, shape index: {}]   ;;  %s1188_s1 = inlined_call_operand.vmem [shape: bf16[32,16], index: 1, kind: input, shape index: {}]   ;;  %s1189_s2 = inlined_call_operand.vmem [shape: bf16[16,128], index: 2, kind: input, shape index: {}]   ;;  %s1190_s3 = inlined_call_operand.hbm [shape: f32[8,32,128], index: 3, kind: output, shape index: {}]  }
   0x1   :  { %10 = vsyncpa [#allocation4 + $0x1], 0 }
   0x2   :  { %11 = vsyncpa [#allocation5], 0 }
   0x3   :  { %13 = vsyncpa [#allocation5 + $0x1], 0  ;;  %s972_s12 = smov 0   ;;  %s974_s13 = smov 0  }
   0x4   :  { %s976_s14 = smov 0   ;;  %s978_s15 = smov 0  }
   0x5 LB: > { %s993_s16 = sadd.s32 4294967295, %s944_s15   ;;  %s685_s17 = sadd.s32 4294967294, %s944_s15   ;;  %s944_s15 = sphi %s978_s15, %s1203_s15   ;;  %s940_s14 = sphi %s976_s14, %s1202_s14   ;;  %s936_s13 = sphi %s974_s13, %s1201_s13   ;;  %s932_s12 = sphi %s972_s12, %s1200_s12  }
   0x6   : > { %s997_s18 = sadd.s32 1, %s944_s15   ;;  %s26_s19 = sadd.s32 1, %s940_s14 }
   0x7   : > { %s23_s20 = ssub.s32 %s944_s15, %s997_s18  ;;  %p33_p0 = scmp.ne.s32.totalorder %s940_s14, %s936_s13 }
   0x8   : > { %p24_p1 = scmp.eq.s32.totalorder %s23_s20, 0  ;;  %p34_p2 = scmp.eq.s32.totalorder %s944_s15, 0 }
   0x9   : > { %p39_p3 = scmp.ne.s32.totalorder %s936_s13, %s932_s12  ;;  %p40_p4 = scmp.eq.s32.totalorder %s993_s16, 0 }
   0xa   : > { %s1009_s21 = scalar_select %p24_p1, %s940_s14, %s26_s19  }
   0xb   : > { %p1011_p5 = por %p34_p2, %p33_p0  ;;  %p1015_p6 = por %p40_p4, %p39_p3 }
   0xc   : > { %p105_p7 = scmp.eq.s32.totalorder %s993_s16, 1  ;;  %p111_p8 = scmp.eq.s32.totalorder %s685_s17, 1 }
   0xd   : > { %p807_p10 = scmp.lt.s32.totalorder %s944_s15, 2  ;;  %s137_s26 = sand.u32 1, %s940_s14  }
   0xe   : > { %p1022_p11 = por %p105_p7, %p33_p0  ;;  %p1026_p12 = por %p111_p8, %p39_p3 }
   0xf   : > { %s727_s27 = sshll.u32 %s944_s15, 10  ;;  %s688_s28 = sshll.u32 %s137_s26, 6 }
  0x10   : > { %s1194_s24 = scalar_select %p1022_p11, 1, 0 }
  0x11   : > { %s1195_s25 = scalar_select %p1026_p12, 1, 0 }
  0x12   : > { %s1035_s4 = scalar_lea.hbm %s1187_s0, %s727_s27  ;;  %s141_s5 = scalar_lea.vmem [#allocation3], %s688_s28 }
  0x13   : > { %s149_s6 = sshll.u32 %s141_s5, 4  ;;  %p1039_p13 = pnand %p807_p10, %p1011_p5  ;;  %s1043_s6 = int_to_ptr.vmem [resolvable:$true] %s149_s6 }
  0x14   : > { %s1045_s8 = scalar_lea.sflag [#allocation4], %s137_s26  ;;  %s848_s9 = scalar_lea.hbm %s1035_s4, 1024 }
  0x15   : > { %p849_p0 = scmp.ne.s32.totalorder %s1035_s4, %s848_s9  ;;  %p850_p1 = pneg %p1039_p13 }
  0x16   : > { %s853_s17 = scalar_lea.hbm %s1187_s0, 2048  ;;  %p854_p4 = scmp.lt.u32.totalorder %s1035_s4, %s1187_s0 }
  0x17   : > { %p851_p2 = pnand %p850_p1, %p849_p0  ;;  %p855_p5 = scmp.lt.u32.totalorder %s853_s17, %s848_s9 }
  0x18   : > { %p857_p8 = scmp.lt.u32.totalorder %s848_s9, %s1035_s4 }
  0x19   : > { %p852_p3 = pneg %p851_p2  ;;  %p856_p7 = por %p855_p5, %p854_p4 }
  0x1b   : > { %p858_p10 = por %p857_p8, %p856_p7 }
  0x1d   : > { %p859_p9 = pnand %p858_p10, %p852_p3 }
  0x1f   : > { %862 = shalt.err (!%p859_p9)
}
  0x20   : > { %s863_s22 = scalar_lea.vmem %s1043_s6, 1024  ;;  %s946_s26 = smov [#allocation3]  }
  0x21   : > { %p864_p0 = scmp.ne.s32.totalorder %s1043_s6, %s863_s22  ;;  %s868_s27 = sshll.u32 %s946_s26, 4  ;;  %s869_s27 = int_to_ptr.vmem [resolvable:$false] %s868_s27 }
  0x22   : > { %s870_s28 = scalar_lea.vmem %s869_s27, 2048  ;;  %p871_p11 = scmp.lt.s32.totalorder %s1043_s6, %s869_s27 }
  0x23   : > { %p866_p2 = pnand %p864_p0, %p850_p1  ;;  %p872_p4 = scmp.lt.s32.totalorder %s870_s28, %s863_s22 }
  0x25   : > { %p867_p12 = pneg %p866_p2  ;;  %p873_p5 = por %p872_p4, %p871_p11 }
  0x27   : > { %p874_p7 = pnand %p873_p5, %p867_p12 }
  0x29   : > { %877 = shalt.err (!%p874_p7)
}
  0x2a   : > { %s947_s29 = smov 128   ;;  %s948_s30 = smov 8  }
  0x2b   : > { %802 = dma.hbm_to_vmem [thread:$0]  (!%p1039_p13), %s1035_s4, 1024, %s1043_s6, %s1045_s8, %s947_s29, %s947_s29, %s948_s30  }
  0x2c   : > { %p692_p9 = scmp.ge.s32.totalorder %s944_s15, 1  ;;  %p157_p1 = scmp.lt.s32.totalorder %s944_s15, 3 }
  0x2e   : > { %p158_p3 = pnand %p692_p9, %p157_p1 }
  0x2f   : > { %s1076_s5 = sand.u32 (!%p158_p3), 1, %s936_s13  }
  0x30   : > { %161 = sbr.rel (%p158_p3) target bundleno = 535 (0x217), region = 32  ;;  %s693_s9 = sshll.u32 (!%p158_p3), %s1076_s5, 6 }
  0x31   : > { %s164_s10 = scalar_lea.sflag (!%p158_p3), [#allocation4], %s1076_s5  ;;  %s167_s11 = scalar_lea.vmem (!%p158_p3), [#allocation3], %s693_s9 }
  0x37   : > { %923 = dma.done.wait (%p1015_p6), %s164_s10, 1024  }
  0x38   : > { %925 = vsyncadd (%p1015_p6), %s164_s10, 4294966272  ;;  %v197_v0 = vld [vmem:[%s167_s11] sm:$0xff]  ;;  %v198_v1 = vld [vmem:[%s167_s11 + $0x8] sm:$0xff]  ;;  %vm210_vm0 = vcmask 130048   ;;  %s694_s19 = sshll.u32 %s1076_s5, 7  ;;  %s729_s22 = sshll.u32 %s993_s16, 11 }
  0x39   : > { %v199_v2 = vpack.c.bf16 %v198_v1, %v197_v0  ;;  %v845_v3 = vld [vmem:[%s1188_s1] sm:$0xff]   ;;  %v846_v4 = vld [vmem:[%s1188_s1 + $0x8] sm:$0xff]   ;;  %v699_v7 = vld [vmem:[%s167_s11 + $0x10] sm:$0xff]  ;;  %s1118_s20 = scalar_lea.vmem [#allocation6], %s694_s19  ;;  %s1138_s29 = scalar_lea.hbm %s1190_s3, %s729_s22 }
  0x3a   : > { %v703_v5 = vld [vmem:[%s167_s11 + $0x20] sm:$0xff]  ;;  %753 = vmatprep.mubr.msk.bf16.mxu0 %vm210_vm0, %v845_v3  ;;  %v704_v6 = vld [vmem:[%s167_s11 + $0x28] sm:$0xff]  ;;  %v700_v8 = vld [vmem:[%s167_s11 + $0x18] sm:$0xff]  ;;  %759 = vmatprep.mubr.msk.bf16.mxu1 %vm210_vm0, %v845_v3  ;;  %s612_s26 = sshll.u32 %s1118_s20, 4  ;;  %s598_s16 = scalar_lea.sflag [#allocation5], %s1076_s5  ;;  %s1140_s26 = int_to_ptr.vmem [resolvable:$true] %s612_s26 }
  0x3b   : > { %751 = vmatprep.subr.bf16.mxu0 %v199_v2  ;;  %v331_v9 = vpack.c.bf16 %v704_v6, %v703_v5  ;;  %v273_v10 = vpack.c.bf16 %v700_v8, %v699_v7  ;;  %v707_v11 = vld [vmem:[%s167_s11 + $0x30] sm:$0xff]  ;;  %v708_v12 = vld [vmem:[%s167_s11 + $0x38] sm:$0xff]  ;;  %v847_v14 = vld [vmem:[%s1189_s2] sm:$0xff]   ;;  %s878_s30 = scalar_lea.vmem %s1140_s26, 2048  ;;  %p1197_p11 = scmp.ne.s32.totalorder %s1194_s24, 0 }
  0x3c   : > { %752 = vmatpush3.bf16.msra.mxu0 %v199_v2  ;;  %v389_v13 = vpack.c.bf16 %v708_v12, %v707_v11  ;;  %p879_p6 = scmp.ne.s32.totalorder %s1140_s26, %s878_s30  ;;  %s949_s9 = smov [#allocation6]  }
  0x3d   : > { %763 = vmatprep.subr.bf16.mxu0 %v331_v9  ;;  %757 = vmatprep.subr.bf16.mxu1 %v273_v10  ;;  %s882_s10 = sshll.u32 %s949_s9, 4  ;;  %s883_s10 = int_to_ptr.vmem [resolvable:$false] %s882_s10 }
  0x3e   : > { %758 = vmatpush3.bf16.msra.mxu1 %v273_v10  ;;  %p880_p12 = pnand %p879_p6, %p1197_p11  ;;  %s884_s11 = scalar_lea.vmem %s883_s10, 4096 }
  0x3f   : > { %754 = vmatmul.mubr.msk.bf16.vlgmr.msra.gmra.mrb[0].mxu0 %vm210_vm0, %v846_v4  ;;  %769 = vmatprep.subr.bf16.mxu1 %v389_v13  ;;  %p885_p8 = scmp.lt.s32.totalorder %s1140_s26, %s883_s10  ;;  %p886_p10 = scmp.lt.s32.totalorder %s884_s11, %s878_s30 }
  0x40   : > { %764 = vmatpush3.bf16.msra.mxu0 %v331_v9  ;;  %765 = vmatprep.mubr.msk.bf16.mxu0 %vm210_vm0, %v845_v3  ;;  %p881_p13 = pneg %p880_p12 }
  0x41   : > { %760 = vmatmul.mubr.msk.bf16.vlgmr.msra.gmra.mrb[0].mxu1 %vm210_vm0, %v846_v4  ;;  %775 = vmatprep.subr.bf16.mxu0 %v847_v14  ;;  %p887_p0 = por %p886_p10, %p885_p8 }
  0x42   : > { %770 = vmatpush3.bf16.msra.mxu1 %v389_v13  ;;  %771 = vmatprep.mubr.msk.bf16.mxu1 %vm210_vm0, %v845_v3 }
  0x43   : > { %793 = vmatprep.subr.bf16.mxu1 %v847_v14  ;;  %p888_p2 = pnand %p887_p0, %p881_p13 }
  0x47   : > { %766 = vmatmul.mubr.msk.bf16.vlgmr.msra.gmra.mrb[4].mxu0 %vm210_vm0, %v846_v4 }
  0x48   : > { %776 = vmatpush3.bf16.msra.mxu0 %v847_v14 }
  0x49   : > { %772 = vmatmul.mubr.msk.bf16.vlgmr.msra.gmra.mrb[4].mxu1 %vm210_vm0, %v846_v4 }
  0x4a   : > { %794 = vmatpush3.bf16.msra.mxu1 %v847_v14 }
 0x112   : > { %v755_v15 = vpop.f32.mrb[0].mxu0 }
 0x113   : > { %v251_v16 = vpop.f32.mrb[1].mxu0 }
 0x114   : > { %v756_v17 = vpop.f32.mrb[2].mxu0  ;;  %v761_v20 = vpop.f32.mrb[0].mxu1 }
 0x115   : > { %v267_v18 = vpack.c.bf16 %v756_v17, %v755_v15  ;;  %v254_v19 = vpop.f32.mrb[3].mxu0  ;;  %v308_v22 = vpop.f32.mrb[1].mxu1 }
 0x116   : > { %v266_v21 = vpack.c.bf16 %v254_v19, %v251_v16  ;;  %v762_v23 = vpop.f32.mrb[2].mxu1 }
 0x117   : > { %269 = vst.msk [vmem:[#allocation2 + $0x8] sm:$0xff] %vm210_vm0, %v267_v18  ;;  %v324_v24 = vpack.c.bf16 %v762_v23, %v761_v20  ;;  %v311_v25 = vpop.f32.mrb[3].mxu1 }
 0x118   : > { %268 = vst.msk [vmem:[#allocation2] sm:$0xff] %vm210_vm0, %v266_v21  ;;  %v323_v26 = vpack.c.bf16 %v311_v25, %v308_v22 }
 0x119   : > { %327 = vst.msk [vmem:[#allocation2 + $0x18] sm:$0xff] %vm210_vm0, %v324_v24 }
 0x11a   : > { %v767_v27 = vpop.f32.mrb[4].mxu0  ;;  %326 = vst.msk [vmem:[#allocation2 + $0x10] sm:$0xff] %vm210_vm0, %v323_v26 }
 0x11b   : > { %v366_v28 = vpop.f32.mrb[5].mxu0 }
 0x11c   : > { %v768_v29 = vpop.f32.mrb[6].mxu0  ;;  %v773_v32 = vpop.f32.mrb[4].mxu1 }
 0x11d   : > { %v382_v30 = vpack.c.bf16 %v768_v29, %v767_v27  ;;  %v369_v31 = vpop.f32.mrb[7].mxu0  ;;  %v424_v34 = vpop.f32.mrb[5].mxu1 }
 0x11e   : > { %v381_v33 = vpack.c.bf16 %v369_v31, %v366_v28  ;;  %v774_v36 = vpop.f32.mrb[6].mxu1  ;;  %v445_v37 = vld [vmem:[#allocation2 + $0x8] sm:$0xff] }
 0x11f   : > { %385 = vst.msk [vmem:[#allocation2 + $0x28] sm:$0xff] %vm210_vm0, %v382_v30  ;;  %v444_v35 = vld [vmem:[#allocation2] sm:$0xff]  ;;  %v440_v38 = vpack.c.bf16 %v774_v36, %v773_v32  ;;  %v427_v39 = vpop.f32.mrb[7].mxu1 }
 0x120   : > { %384 = vst.msk [vmem:[#allocation2 + $0x20] sm:$0xff] %vm210_vm0, %v381_v33  ;;  %777 = vmatprep.mubr.msk.bf16.mxu0 %vm210_vm0, %v444_v35  ;;  %v439_v40 = vpack.c.bf16 %v427_v39, %v424_v34  ;;  %v447_v43 = vld [vmem:[#allocation2 + $0x18] sm:$0xff] }
 0x121   : > { %778 = vmatmul.mubr.msk.bf16.vlgmr.msra.gmra.mrb[8].mxu0 %vm210_vm0, %v445_v37  ;;  %443 = vst.msk [vmem:[#allocation2 + $0x38] sm:$0xff] %vm210_vm0, %v440_v38  ;;  %v446_v41 = vld [vmem:[#allocation2 + $0x10] sm:$0xff] }
 0x122   : > { %442 = vst.msk [vmem:[#allocation2 + $0x30] sm:$0xff] %vm210_vm0, %v439_v40  ;;  %781 = vmatprep.mubr.msk.bf16.mxu0 %vm210_vm0, %v446_v41 }
 0x126   : > { %v449_v44 = vld [vmem:[#allocation2 + $0x28] sm:$0xff] }
 0x127   : > { %v448_v42 = vld [vmem:[#allocation2 + $0x20] sm:$0xff] }
 0x128   : > { %785 = vmatprep.mubr.msk.bf16.mxu1 %vm210_vm0, %v448_v42  ;;  %v451_v46 = vld [vmem:[#allocation2 + $0x38] sm:$0xff] }
 0x129   : > { %782 = vmatmul.mubr.msk.bf16.gmra.mrb[12].mxu0 %vm210_vm0, %v447_v43  ;;  %786 = vmatmul.mubr.msk.bf16.vlgmr.msra.gmra.mrb[8].mxu1 %vm210_vm0, %v449_v44  ;;  %v450_v45 = vld [vmem:[#allocation2 + $0x30] sm:$0xff] }
 0x12a   : > { %789 = vmatprep.mubr.msk.bf16.mxu1 %vm210_vm0, %v450_v45 }
 0x131   : > { %790 = vmatmul.mubr.msk.bf16.gmra.mrb[12].mxu1 %vm210_vm0, %v451_v46 }
 0x1f4   : > { %v779_v47 = vpop.f32.mrb[8].mxu0 }
 0x1f5   : > { %583 = vst [vmem:[%s1118_s20 + $0x10] sm:$0xff] %v779_v47  ;;  %v518_v48 = vpop.f32.mrb[9].mxu0 }
 0x1f6   : > { %581 = vst [vmem:[%s1118_s20] sm:$0xff] %v518_v48  ;;  %v780_v49 = vpop.f32.mrb[10].mxu0 }
 0x1f7   : > { %584 = vst [vmem:[%s1118_s20 + $0x18] sm:$0xff] %v780_v49  ;;  %v521_v50 = vpop.f32.mrb[11].mxu0 }
 0x1f8   : > { %582 = vst [vmem:[%s1118_s20 + $0x8] sm:$0xff] %v521_v50 }
 0x1fc   : > { %v783_v51 = vpop.f32.mrb[12].mxu0  ;;  %v787_v52 = vpop.f32.mrb[8].mxu1 }
 0x1fd   : > { %587 = vst [vmem:[%s1118_s20 + $0x30] sm:$0xff] %v783_v51  ;;  %591 = vst [vmem:[%s1118_s20 + $0x50] sm:$0xff] %v787_v52  ;;  %v534_v53 = vpop.f32.mrb[13].mxu0  ;;  %v550_v54 = vpop.f32.mrb[9].mxu1 }
 0x1fe   : > { %585 = vst [vmem:[%s1118_s20 + $0x20] sm:$0xff] %v534_v53  ;;  %589 = vst [vmem:[%s1118_s20 + $0x40] sm:$0xff] %v550_v54  ;;  %v784_v55 = vpop.f32.mrb[14].mxu0  ;;  %v788_v56 = vpop.f32.mrb[10].mxu1 }
 0x1ff   : > { %588 = vst [vmem:[%s1118_s20 + $0x38] sm:$0xff] %v784_v55  ;;  %592 = vst [vmem:[%s1118_s20 + $0x58] sm:$0xff] %v788_v56  ;;  %v537_v57 = vpop.f32.mrb[15].mxu0  ;;  %v553_v58 = vpop.f32.mrb[11].mxu1 }
 0x200   : > { %586 = vst [vmem:[%s1118_s20 + $0x28] sm:$0xff] %v537_v57  ;;  %590 = vst [vmem:[%s1118_s20 + $0x48] sm:$0xff] %v553_v58 }
 0x204   : > { %v791_v59 = vpop.f32.mrb[12].mxu1 }
 0x205   : > { %595 = vst [vmem:[%s1118_s20 + $0x70] sm:$0xff] %v791_v59  ;;  %v566_v60 = vpop.f32.mrb[13].mxu1 }
 0x206   : > { %593 = vst [vmem:[%s1118_s20 + $0x60] sm:$0xff] %v566_v60  ;;  %v792_v61 = vpop.f32.mrb[14].mxu1 }
 0x207   : > { %596 = vst [vmem:[%s1118_s20 + $0x78] sm:$0xff] %v792_v61  ;;  %v569_v62 = vpop.f32.mrb[15].mxu1 }
 0x208   : > { %594 = vst [vmem:[%s1118_s20 + $0x68] sm:$0xff] %v569_v62 }
 0x209   : > { %891 = shalt.err (!%p888_p2)
}
 0x20a   : > { %s892_s4 = scalar_lea.hbm %s1138_s29, 2048  ;;  %s896_s8 = scalar_lea.hbm %s1190_s3, 4096 }
 0x20b   : > { %p893_p4 = scmp.ne.s32.totalorder %s1138_s29, %s892_s4  ;;  %p897_p9 = scmp.lt.u32.totalorder %s1138_s29, %s1190_s3 }
 0x20c   : > { %p898_p1 = scmp.lt.u32.totalorder %s896_s8, %s892_s4  ;;  %p900_p6 = scmp.lt.u32.totalorder %s892_s4, %s1138_s29 }
 0x20d   : > { %p894_p5 = pnand %p893_p4, %p1197_p11 }
 0x20e   : > { %p899_p3 = por %p898_p1, %p897_p9 }
 0x20f   : > { %p895_p7 = pneg %p894_p5 }
 0x210   : > { %p901_p12 = por %p900_p6, %p899_p3 }
 0x212   : > { %p902_p13 = pnand %p901_p12, %p895_p7 }
 0x214   : > { %905 = shalt.err (!%p902_p13)
}
 0x215   : > { %s950_s19 = smov 128   ;;  %s951_s20 = smov 8  }
 0x216   : > { %797 = dma.vmem_to_hbm [thread:$0]  (%p1197_p11), %s1140_s26, 2048, %s1138_s29, %s598_s16, %s950_s19, %s950_s19, %s951_s20  }
 0x217 PF: > { %s627_s22 = sand.u32 1, %s932_s12   ;;  %p1198_p8 = scmp.ne.s32.totalorder %s1195_s25, 0 }
 0x218   : > { %p1199_p10 = scmp.ge.s32.totalorder %s944_s15, 2  ;;  %s628_s27 = scalar_lea.sflag [#allocation5], %s627_s22 }
 0x21a   : > { %p804_p0 = pnand %p1199_p10, %p1198_p8 }
 0x21c   : > { %927 = dma.done.wait (!%p804_p0), %s628_s27, 2048  }
 0x21d   : > { %929 = vsyncadd (!%p804_p0), %s628_s27, 4294965248  ;;  %p16_p2 = scmp.ge.s32.totalorder %s997_s18, 4   ;;  %s1200_s12 = smov %s936_s13 }
 0x21e   : > { %s1201_s13 = smov %s940_s14  ;;  %s1202_s14 = smov %s1009_s21 }
 0x21f   : > { %s1203_s15 = smov %s997_s18  ;;  %18 = sbr.rel (!%p16_p2) target bundleno = 5 (0x5), region = 83 }
 0x226   :  { %633 = vsyncpa [#allocation4], 1 }
 0x227   :  { %635 = vsyncpa [#allocation4 + $0x1], 1 }
 0x228   :  { %636 = vsyncpa [#allocation5], 1 }
 0x229   :  { %638 = vsyncpa [#allocation5 + $0x1], 1 }

// kernel: tpu_custom_call.1
= control target key start
LH: loop header
LB: loop body
LE: loop exit
PB: predicated region body
PF: predicated region fallthrough
CT: control target
= control target key end

     0   :  { %8 = vsyncpa [#allocation4], 0  ;;  %s1187_s0 = inlined_call_operand.hbm [shape: f32[8,16,16], index: 0, kind: input, shape index: {}]   ;;  %s1188_s1 = inlined_call_operand.vmem [shape: bf16[32,16], index: 1, kind: input, shape index: {}]   ;;  %s1189_s2 = inlined_call_operand.vmem [shape: bf16[16,128], index: 2, kind: input, shape index: {}]   ;;  %s1190_s3 = inlined_call_operand.hbm [shape: f32[8,32,128], index: 3, kind: output, shape index: {}]  }
   0x1   :  { %10 = vsyncpa [#allocation4 + $0x1], 0 }
   0x2   :  { %11 = vsyncpa [#allocation5], 0 }
   0x3   :  { %13 = vsyncpa [#allocation5 + $0x1], 0  ;;  %s972_s12 = smov 0   ;;  %s974_s13 = smov 0  }
   0x4   :  { %s976_s14 = smov 0   ;;  %s978_s15 = smov 0  }
   0x5 LB: > { %s993_s16 = sadd.s32 4294967295, %s944_s15   ;;  %s685_s17 = sadd.s32 4294967294, %s944_s15   ;;  %s944_s15 = sphi %s978_s15, %s1203_s15   ;;  %s940_s14 = sphi %s976_s14, %s1202_s14   ;;  %s936_s13 = sphi %s974_s13, %s1201_s13   ;;  %s932_s12 = sphi %s972_s12, %s1200_s12  }
   0x6   : > { %s997_s18 = sadd.s32 1, %s944_s15   ;;  %s26_s19 = sadd.s32 1, %s940_s14 }
   0x7   : > { %s23_s20 = ssub.s32 %s944_s15, %s997_s18  ;;  %p33_p0 = scmp.ne.s32.totalorder %s940_s14, %s936_s13 }
   0x8   : > { %p24_p1 = scmp.eq.s32.totalorder %s23_s20, 0  ;;  %p34_p2 = scmp.eq.s32.totalorder %s944_s15, 0 }
   0x9   : > { %p39_p3 = scmp.ne.s32.totalorder %s936_s13, %s932_s12  ;;  %p40_p4 = scmp.eq.s32.totalorder %s993_s16, 0 }
   0xa   : > { %s1009_s21 = scalar_select %p24_p1, %s940_s14, %s26_s19  }
   0xb   : > { %p1011_p5 = por %p34_p2, %p33_p0  ;;  %p1015_p6 = por %p40_p4, %p39_p3 }
   0xc   : > { %p105_p7 = scmp.eq.s32.totalorder %s993_s16, 1  ;;  %p111_p8 = scmp.eq.s32.totalorder %s685_s17, 1 }
   0xd   : > { %p807_p10 = scmp.lt.s32.totalorder %s944_s15, 2  ;;  %s137_s26 = sand.u32 1, %s940_s14  }
   0xe   : > { %p1022_p11 = por %p105_p7, %p33_p0  ;;  %p1026_p12 = por %p111_p8, %p39_p3 }
   0xf   : > { %s727_s27 = sshll.u32 %s944_s15, 10  ;;  %s688_s28 = sshll.u32 %s137_s26, 6 }
  0x10   : > { %s1194_s24 = scalar_select %p1022_p11, 1, 0 }
  0x11   : > { %s1195_s25 = scalar_select %p1026_p12, 1, 0 }
  0x12   : > { %s1035_s4 = scalar_lea.hbm %s1187_s0, %s727_s27  ;;  %s141_s5 = scalar_lea.vmem [#allocation3], %s688_s28 }
  0x13   : > { %s149_s6 = sshll.u32 %s141_s5, 4  ;;  %p1039_p13 = pnand %p807_p10, %p1011_p5  ;;  %s1043_s6 = int_to_ptr.vmem [resolvable:$true] %s149_s6 }
  0x14   : > { %s1045_s8 = scalar_lea.sflag [#allocation4], %s137_s26  ;;  %s848_s9 = scalar_lea.hbm %s1035_s4, 1024 }
  0x15   : > { %p849_p0 = scmp.ne.s32.totalorder %s1035_s4, %s848_s9  ;;  %p850_p1 = pneg %p1039_p13 }
  0x16   : > { %s853_s17 = scalar_lea.hbm %s1187_s0, 2048  ;;  %p854_p4 = scmp.lt.u32.totalorder %s1035_s4, %s1187_s0 }
  0x17   : > { %p851_p2 = pnand %p850_p1, %p849_p0  ;;  %p855_p5 = scmp.lt.u32.totalorder %s853_s17, %s848_s9 }
  0x18   : > { %p857_p8 = scmp.lt.u32.totalorder %s848_s9, %s1035_s4 }
  0x19   : > { %p852_p3 = pneg %p851_p2  ;;  %p856_p7 = por %p855_p5, %p854_p4 }
  0x1b   : > { %p858_p10 = por %p857_p8, %p856_p7 }
  0x1d   : > { %p859_p9 = pnand %p858_p10, %p852_p3 }
  0x1f   : > { %862 = shalt.err (!%p859_p9)
}
  0x20   : > { %s863_s22 = scalar_lea.vmem %s1043_s6, 1024  ;;  %s946_s26 = smov [#allocation3]  }
  0x21   : > { %p864_p0 = scmp.ne.s32.totalorder %s1043_s6, %s863_s22  ;;  %s868_s27 = sshll.u32 %s946_s26, 4  ;;  %s869_s27 = int_to_ptr.vmem [resolvable:$false] %s868_s27 }
  0x22   : > { %s870_s28 = scalar_lea.vmem %s869_s27, 2048  ;;  %p871_p11 = scmp.lt.s32.totalorder %s1043_s6, %s869_s27 }
  0x23   : > { %p866_p2 = pnand %p864_p0, %p850_p1  ;;  %p872_p4 = scmp.lt.s32.totalorder %s870_s28, %s863_s22 }
  0x25   : > { %p867_p12 = pneg %p866_p2  ;;  %p873_p5 = por %p872_p4, %p871_p11 }
  0x27   : > { %p874_p7 = pnand %p873_p5, %p867_p12 }
  0x29   : > { %877 = shalt.err (!%p874_p7)
}
  0x2a   : > { %s947_s29 = smov 128   ;;  %s948_s30 = smov 8  }
  0x2b   : > { %802 = dma.hbm_to_vmem [thread:$0]  (!%p1039_p13), %s1035_s4, 1024, %s1043_s6, %s1045_s8, %s947_s29, %s947_s29, %s948_s30  }
  0x2c   : > { %p692_p9 = scmp.ge.s32.totalorder %s944_s15, 1  ;;  %p157_p1 = scmp.lt.s32.totalorder %s944_s15, 3 }
  0x2e   : > { %p158_p3 = pnand %p692_p9, %p157_p1 }
  0x2f   : > { %s1076_s5 = sand.u32 (!%p158_p3), 1, %s936_s13  }
  0x30   : > { %161 = sbr.rel (%p158_p3) target bundleno = 535 (0x217), region = 32  ;;  %s693_s9 = sshll.u32 (!%p158_p3), %s1076_s5, 6 }
  0x31   : > { %s164_s10 = scalar_lea.sflag (!%p158_p3), [#allocation4], %s1076_s5  ;;  %s167_s11 = scalar_lea.vmem (!%p158_p3), [#allocation3], %s693_s9 }
  0x37   : > { %923 = dma.done.wait (%p1015_p6), %s164_s10, 1024  }
  0x38   : > { %925 = vsyncadd (%p1015_p6), %s164_s10, 4294966272  ;;  %v197_v0 = vld [vmem:[%s167_s11] sm:$0xff]  ;;  %v198_v1 = vld [vmem:[%s167_s11 + $0x8] sm:$0xff]  ;;  %vm210_vm0 = vcmask 130048   ;;  %s694_s19 = sshll.u32 %s1076_s5, 7  ;;  %s729_s22 = sshll.u32 %s993_s16, 11 }
  0x39   : > { %v199_v2 = vpack.c.bf16 %v198_v1, %v197_v0  ;;  %v845_v3 = vld [vmem:[%s1188_s1] sm:$0xff]   ;;  %v846_v4 = vld [vmem:[%s1188_s1 + $0x8] sm:$0xff]   ;;  %v699_v7 = vld [vmem:[%s167_s11 + $0x10] sm:$0xff]  ;;  %s1118_s20 = scalar_lea.vmem [#allocation6], %s694_s19  ;;  %s1138_s29 = scalar_lea.hbm %s1190_s3, %s729_s22 }
  0x3a   : > { %v703_v5 = vld [vmem:[%s167_s11 + $0x20] sm:$0xff]  ;;  %753 = vmatprep.mubr.msk.bf16.mxu0 %vm210_vm0, %v845_v3  ;;  %v704_v6 = vld [vmem:[%s167_s11 + $0x28] sm:$0xff]  ;;  %v700_v8 = vld [vmem:[%s167_s11 + $0x18] sm:$0xff]  ;;  %759 = vmatprep.mubr.msk.bf16.mxu1 %vm210_vm0, %v845_v3  ;;  %s612_s26 = sshll.u32 %s1118_s20, 4  ;;  %s598_s16 = scalar_lea.sflag [#allocation5], %s1076_s5  ;;  %s1140_s26 = int_to_ptr.vmem [resolvable:$true] %s612_s26 }
  0x3b   : > { %751 = vmatprep.subr.bf16.mxu0 %v199_v2  ;;  %v331_v9 = vpack.c.bf16 %v704_v6, %v703_v5  ;;  %v273_v10 = vpack.c.bf16 %v700_v8, %v699_v7  ;;  %v707_v11 = vld [vmem:[%s167_s11 + $0x30] sm:$0xff]  ;;  %v708_v12 = vld [vmem:[%s167_s11 + $0x38] sm:$0xff]  ;;  %v847_v14 = vld [vmem:[%s1189_s2] sm:$0xff]   ;;  %s878_s30 = scalar_lea.vmem %s1140_s26, 2048  ;;  %p1197_p11 = scmp.ne.s32.totalorder %s1194_s24, 0 }
  0x3c   : > { %752 = vmatpush3.bf16.msra.mxu0 %v199_v2  ;;  %v389_v13 = vpack.c.bf16 %v708_v12, %v707_v11  ;;  %p879_p6 = scmp.ne.s32.totalorder %s1140_s26, %s878_s30  ;;  %s949_s9 = smov [#allocation6]  }
  0x3d   : > { %763 = vmatprep.subr.bf16.mxu0 %v331_v9  ;;  %757 = vmatprep.subr.bf16.mxu1 %v273_v10  ;;  %s882_s10 = sshll.u32 %s949_s9, 4  ;;  %s883_s10 = int_to_ptr.vmem [resolvable:$false] %s882_s10 }
  0x3e   : > { %758 = vmatpush3.bf16.msra.mxu1 %v273_v10  ;;  %p880_p12 = pnand %p879_p6, %p1197_p11  ;;  %s884_s11 = scalar_lea.vmem %s883_s10, 4096 }
  0x3f   : > { %754 = vmatmul.mubr.msk.bf16.vlgmr.msra.gmra.mrb[0].mxu0 %vm210_vm0, %v846_v4  ;;  %769 = vmatprep.subr.bf16.mxu1 %v389_v13  ;;  %p885_p8 = scmp.lt.s32.totalorder %s1140_s26, %s883_s10  ;;  %p886_p10 = scmp.lt.s32.totalorder %s884_s11, %s878_s30 }
  0x40   : > { %764 = vmatpush3.bf16.msra.mxu0 %v331_v9  ;;  %765 = vmatprep.mubr.msk.bf16.mxu0 %vm210_vm0, %v845_v3  ;;  %p881_p13 = pneg %p880_p12 }
  0x41   : > { %760 = vmatmul.mubr.msk.bf16.vlgmr.msra.gmra.mrb[0].mxu1 %vm210_vm0, %v846_v4  ;;  %775 = vmatprep.subr.bf16.mxu0 %v847_v14  ;;  %p887_p0 = por %p886_p10, %p885_p8 }
  0x42   : > { %770 = vmatpush3.bf16.msra.mxu1 %v389_v13  ;;  %771 = vmatprep.mubr.msk.bf16.mxu1 %vm210_vm0, %v845_v3 }
  0x43   : > { %793 = vmatprep.subr.bf16.mxu1 %v847_v14  ;;  %p888_p2 = pnand %p887_p0, %p881_p13 }
  0x47   : > { %766 = vmatmul.mubr.msk.bf16.vlgmr.msra.gmra.mrb[4].mxu0 %vm210_vm0, %v846_v4 }
  0x48   : > { %776 = vmatpush3.bf16.msra.mxu0 %v847_v14 }
  0x49   : > { %772 = vmatmul.mubr.msk.bf16.vlgmr.msra.gmra.mrb[4].mxu1 %vm210_vm0, %v846_v4 }
  0x4a   : > { %794 = vmatpush3.bf16.msra.mxu1 %v847_v14 }
 0x112   : > { %v755_v15 = vpop.f32.mrb[0].mxu0 }
 0x113   : > { %v251_v16 = vpop.f32.mrb[1].mxu0 }
 0x114   : > { %v756_v17 = vpop.f32.mrb[2].mxu0  ;;  %v761_v20 = vpop.f32.mrb[0].mxu1 }
 0x115   : > { %v267_v18 = vpack.c.bf16 %v756_v17, %v755_v15  ;;  %v254_v19 = vpop.f32.mrb[3].mxu0  ;;  %v308_v22 = vpop.f32.mrb[1].mxu1 }
 0x116   : > { %v266_v21 = vpack.c.bf16 %v254_v19, %v251_v16  ;;  %v762_v23 = vpop.f32.mrb[2].mxu1 }
 0x117   : > { %269 = vst.msk [vmem:[#allocation2 + $0x8] sm:$0xff] %vm210_vm0, %v267_v18  ;;  %v324_v24 = vpack.c.bf16 %v762_v23, %v761_v20  ;;  %v311_v25 = vpop.f32.mrb[3].mxu1 }
 0x118   : > { %268 = vst.msk [vmem:[#allocation2] sm:$0xff] %vm210_vm0, %v266_v21  ;;  %v323_v26 = vpack.c.bf16 %v311_v25, %v308_v22 }
 0x119   : > { %327 = vst.msk [vmem:[#allocation2 + $0x18] sm:$0xff] %vm210_vm0, %v324_v24 }
 0x11a   : > { %v767_v27 = vpop.f32.mrb[4].mxu0  ;;  %326 = vst.msk [vmem:[#allocation2 + $0x10] sm:$0xff] %vm210_vm0, %v323_v26 }
 0x11b   : > { %v366_v28 = vpop.f32.mrb[5].mxu0 }
 0x11c   : > { %v768_v29 = vpop.f32.mrb[6].mxu0  ;;  %v773_v32 = vpop.f32.mrb[4].mxu1 }
 0x11d   : > { %v382_v30 = vpack.c.bf16 %v768_v29, %v767_v27  ;;  %v369_v31 = vpop.f32.mrb[7].mxu0  ;;  %v424_v34 = vpop.f32.mrb[5].mxu1 }
 0x11e   : > { %v381_v33 = vpack.c.bf16 %v369_v31, %v366_v28  ;;  %v774_v36 = vpop.f32.mrb[6].mxu1  ;;  %v445_v37 = vld [vmem:[#allocation2 + $0x8] sm:$0xff] }
 0x11f   : > { %385 = vst.msk [vmem:[#allocation2 + $0x28] sm:$0xff] %vm210_vm0, %v382_v30  ;;  %v444_v35 = vld [vmem:[#allocation2] sm:$0xff]  ;;  %v440_v38 = vpack.c.bf16 %v774_v36, %v773_v32  ;;  %v427_v39 = vpop.f32.mrb[7].mxu1 }
 0x120   : > { %384 = vst.msk [vmem:[#allocation2 + $0x20] sm:$0xff] %vm210_vm0, %v381_v33  ;;  %777 = vmatprep.mubr.msk.bf16.mxu0 %vm210_vm0, %v444_v35  ;;  %v439_v40 = vpack.c.bf16 %v427_v39, %v424_v34  ;;  %v447_v43 = vld [vmem:[#allocation2 + $0x18] sm:$0xff] }
 0x121   : > { %778 = vmatmul.mubr.msk.bf16.vlgmr.msra.gmra.mrb[8].mxu0 %vm210_vm0, %v445_v37  ;;  %443 = vst.msk [vmem:[#allocation2 + $0x38] sm:$0xff] %vm210_vm0, %v440_v38  ;;  %v446_v41 = vld [vmem:[#allocation2 + $0x10] sm:$0xff] }
 0x122   : > { %442 = vst.msk [vmem:[#allocation2 + $0x30] sm:$0xff] %vm210_vm0, %v439_v40  ;;  %781 = vmatprep.mubr.msk.bf16.mxu0 %vm210_vm0, %v446_v41 }
 0x126   : > { %v449_v44 = vld [vmem:[#allocation2 + $0x28] sm:$0xff] }
 0x127   : > { %v448_v42 = vld [vmem:[#allocation2 + $0x20] sm:$0xff] }
 0x128   : > { %785 = vmatprep.mubr.msk.bf16.mxu1 %vm210_vm0, %v448_v42  ;;  %v451_v46 = vld [vmem:[#allocation2 + $0x38] sm:$0xff] }
 0x129   : > { %782 = vmatmul.mubr.msk.bf16.gmra.mrb[12].mxu0 %vm210_vm0, %v447_v43  ;;  %786 = vmatmul.mubr.msk.bf16.vlgmr.msra.gmra.mrb[8].mxu1 %vm210_vm0, %v449_v44  ;;  %v450_v45 = vld [vmem:[#allocation2 + $0x30] sm:$0xff] }
 0x12a   : > { %789 = vmatprep.mubr.msk.bf16.mxu1 %vm210_vm0, %v450_v45 }
 0x131   : > { %790 = vmatmul.mubr.msk.bf16.gmra.mrb[12].mxu1 %vm210_vm0, %v451_v46 }
 0x1f4   : > { %v779_v47 = vpop.f32.mrb[8].mxu0 }
 0x1f5   : > { %583 = vst [vmem:[%s1118_s20 + $0x10] sm:$0xff] %v779_v47  ;;  %v518_v48 = vpop.f32.mrb[9].mxu0 }
 0x1f6   : > { %581 = vst [vmem:[%s1118_s20] sm:$0xff] %v518_v48  ;;  %v780_v49 = vpop.f32.mrb[10].mxu0 }
 0x1f7   : > { %584 = vst [vmem:[%s1118_s20 + $0x18] sm:$0xff] %v780_v49  ;;  %v521_v50 = vpop.f32.mrb[11].mxu0 }
 0x1f8   : > { %582 = vst [vmem:[%s1118_s20 + $0x8] sm:$0xff] %v521_v50 }
 0x1fc   : > { %v783_v51 = vpop.f32.mrb[12].mxu0  ;;  %v787_v52 = vpop.f32.mrb[8].mxu1 }
 0x1fd   : > { %587 = vst [vmem:[%s1118_s20 + $0x30] sm:$0xff] %v783_v51  ;;  %591 = vst [vmem:[%s1118_s20 + $0x50] sm:$0xff] %v787_v52  ;;  %v534_v53 = vpop.f32.mrb[13].mxu0  ;;  %v550_v54 = vpop.f32.mrb[9].mxu1 }
 0x1fe   : > { %585 = vst [vmem:[%s1118_s20 + $0x20] sm:$0xff] %v534_v53  ;;  %589 = vst [vmem:[%s1118_s20 + $0x40] sm:$0xff] %v550_v54  ;;  %v784_v55 = vpop.f32.mrb[14].mxu0  ;;  %v788_v56 = vpop.f32.mrb[10].mxu1 }
 0x1ff   : > { %588 = vst [vmem:[%s1118_s20 + $0x38] sm:$0xff] %v784_v55  ;;  %592 = vst [vmem:[%s1118_s20 + $0x58] sm:$0xff] %v788_v56  ;;  %v537_v57 = vpop.f32.mrb[15].mxu0  ;;  %v553_v58 = vpop.f32.mrb[11].mxu1 }
 0x200   : > { %586 = vst [vmem:[%s1118_s20 + $0x28] sm:$0xff] %v537_v57  ;;  %590 = vst [vmem:[%s1118_s20 + $0x48] sm:$0xff] %v553_v58 }
 0x204   : > { %v791_v59 = vpop.f32.mrb[12].mxu1 }
 0x205   : > { %595 = vst [vmem:[%s1118_s20 + $0x70] sm:$0xff] %v791_v59  ;;  %v566_v60 = vpop.f32.mrb[13].mxu1 }
 0x206   : > { %593 = vst [vmem:[%s1118_s20 + $0x60] sm:$0xff] %v566_v60  ;;  %v792_v61 = vpop.f32.mrb[14].mxu1 }
 0x207   : > { %596 = vst [vmem:[%s1118_s20 + $0x78] sm:$0xff] %v792_v61  ;;  %v569_v62 = vpop.f32.mrb[15].mxu1 }
 0x208   : > { %594 = vst [vmem:[%s1118_s20 + $0x68] sm:$0xff] %v569_v62 }
 0x209   : > { %891 = shalt.err (!%p888_p2)
}
 0x20a   : > { %s892_s4 = scalar_lea.hbm %s1138_s29, 2048  ;;  %s896_s8 = scalar_lea.hbm %s1190_s3, 4096 }
 0x20b   : > { %p893_p4 = scmp.ne.s32.totalorder %s1138_s29, %s892_s4  ;;  %p897_p9 = scmp.lt.u32.totalorder %s1138_s29, %s1190_s3 }
 0x20c   : > { %p898_p1 = scmp.lt.u32.totalorder %s896_s8, %s892_s4  ;;  %p900_p6 = scmp.lt.u32.totalorder %s892_s4, %s1138_s29 }
 0x20d   : > { %p894_p5 = pnand %p893_p4, %p1197_p11 }
 0x20e   : > { %p899_p3 = por %p898_p1, %p897_p9 }
 0x20f   : > { %p895_p7 = pneg %p894_p5 }
 0x210   : > { %p901_p12 = por %p900_p6, %p899_p3 }
 0x212   : > { %p902_p13 = pnand %p901_p12, %p895_p7 }
 0x214   : > { %905 = shalt.err (!%p902_p13)
}
 0x215   : > { %s950_s19 = smov 128   ;;  %s951_s20 = smov 8  }
 0x216   : > { %797 = dma.vmem_to_hbm [thread:$0]  (%p1197_p11), %s1140_s26, 2048, %s1138_s29, %s598_s16, %s950_s19, %s950_s19, %s951_s20  }
 0x217 PF: > { %s627_s22 = sand.u32 1, %s932_s12   ;;  %p1198_p8 = scmp.ne.s32.totalorder %s1195_s25, 0 }
 0x218   : > { %p1199_p10 = scmp.ge.s32.totalorder %s944_s15, 2  ;;  %s628_s27 = scalar_lea.sflag [#allocation5], %s627_s22 }
 0x21a   : > { %p804_p0 = pnand %p1199_p10, %p1198_p8 }
 0x21c   : > { %927 = dma.done.wait (!%p804_p0), %s628_s27, 2048  }
 0x21d   : > { %929 = vsyncadd (!%p804_p0), %s628_s27, 4294965248  ;;  %p16_p2 = scmp.ge.s32.totalorder %s997_s18, 4   ;;  %s1200_s12 = smov %s936_s13 }
 0x21e   : > { %s1201_s13 = smov %s940_s14  ;;  %s1202_s14 = smov %s1009_s21 }
 0x21f   : > { %s1203_s15 = smov %s997_s18  ;;  %18 = sbr.rel (!%p16_p2) target bundleno = 5 (0x5), region = 83 }
 0x226   :  { %633 = vsyncpa [#allocation4], 1 }
 0x227   :  { %635 = vsyncpa [#allocation4 + $0x1], 1 }
 0x228   :  { %636 = vsyncpa [#allocation5], 1 }
 0x229   :  { %638 = vsyncpa [#allocation5 + $0x1], 1 }

</bundles_post_ra>
